<compile_context>
chip_gen: v5e
topology: v5e:2x2
jax: 0.10.0
libtpu: 0.0.40
codegen_flags: <defaults>
</compile_context>

<pallas_src>
import math
import functools

import jax
import jax.numpy as jnp
from jax import lax
from jax.experimental import pallas as pl
from jax.experimental.pallas import tpu as pltpu


def mhsa_kernel(x_ref, wqkv_ref, bqkv_ref, wout_ref, bout_ref, o_ref,
                qkv_scr, attn_scr, *, num_heads, head_dim, block_b, seq_len):
    """One grid step handles `block_b` batch elements, pre-flattened over rows.

    x_ref    : (block_b*T, D)   f32   VMEM
    wqkv_ref : (D, 3D)          bf16  VMEM (grid-invariant)
    bqkv_ref : (1, 3D)          f32   VMEM (grid-invariant)
    wout_ref : (D, D)           bf16  VMEM (grid-invariant)
    bout_ref : (1, D)           f32   VMEM (grid-invariant)
    o_ref    : (block_b*T, D)   f32   VMEM
    qkv_scr  : (block_b*T, 3D)  f32   VMEM scratch
    attn_scr : (block_b*T, D)   f32   VMEM scratch (lane-concat of head outputs)
    """
    D = num_heads * head_dim
    scale = 1.0 / math.sqrt(head_dim)

    # (1) One big QKV projection for all block_b*T rows: full-depth K=D matmul
    #     on the MXU (bf16 operands, f32 accumulation), one bias broadcast.
    qkv_scr[...] = (
        jnp.dot(x_ref[...].astype(jnp.bfloat16), wqkv_ref[...],
                preferred_element_type=jnp.float32)
        + bqkv_ref[0])

    # (2) Per-batch-element attention.  Head outputs are written into attn_scr
    #     along the lane axis (concat), so the output projection afterwards is
    #     a single full-depth matmul instead of num_heads K=head_dim matmuls.
    def process_batch(row):
        qkv_b = qkv_scr[pl.ds(row, seq_len), :]                   # (T, 3D) f32
        for h in range(num_heads):                                # static, small
            lo = h * head_dim
            # Fold softmax scale into q; cast to bf16 only at the MXU boundary.
            q = (qkv_b[:, lo:lo + head_dim] * scale).astype(jnp.bfloat16)
            k = qkv_b[:, D + lo:D + lo + head_dim].astype(jnp.bfloat16)
            v = qkv_b[:, 2 * D + lo:2 * D + lo + head_dim].astype(jnp.bfloat16)

            # q @ k^T via dot_general (contract last dims) -> no XLU transpose.
            scores = lax.dot_general(
                q, k, dimension_numbers=(((1,), (1,)), ((), ())),
                preferred_element_type=jnp.float32)               # (T, T) f32
            scores = scores - jnp.max(scores, axis=-1, keepdims=True)
            p = jnp.exp(scores)
            p = p * pl.reciprocal(jnp.sum(p, axis=-1, keepdims=True),
                                  approx=True)

            head_out = jnp.dot(p.astype(jnp.bfloat16), v,
                               preferred_element_type=jnp.float32)  # (T, hd)
            # Lane-axis concat: place this head's output at lanes [lo, lo+hd).
            attn_scr[pl.ds(row, seq_len), pl.ds(lo, head_dim)] = head_out

    if block_b == 1:
        process_batch(0)
    else:
        def body(b, carry):
            process_batch(pl.multiple_of(b * seq_len, seq_len))
            return carry
        lax.fori_loop(0, block_b, body, 0)

    # (3) Single full-depth (K=D) output projection + one bias broadcast.
    o_ref[...] = (
        jnp.dot(attn_scr[...].astype(jnp.bfloat16), wout_ref[...],
                preferred_element_type=jnp.float32)
        + bout_ref[0]).astype(o_ref.dtype)


def _vmem_capacity_bytes():
    """Generation-aware physical VMEM (falls back to v7x's 64 MiB per-TC)."""
    try:
        return int(pltpu.get_tpu_info().vmem_capacity_bytes)
    except Exception:
        return 64 * 1024 * 1024


def _vmem_cost(T, D):
    """(fixed_bytes, per_batch_element_bytes) of the kernel's VMEM footprint."""
    per_b = (2 * 2 * T * D * 4          # x + out blocks, double-buffered f32
             + T * 3 * D * 4            # qkv scratch rows
             + T * D * 4)               # attn (concat) scratch rows
    fixed = (2 * 2 * (D * 3 * D + D * D)   # bf16 weights, double-buffered
             + 2 * 4 * (3 * D + D)         # f32 biases, double-buffered
             + T * T * 4                   # one (T, T) f32 score tile
             + T * 3 * D * 4)              # per-b qkv slice temporaries
    return fixed, per_b


def _pick_block_b(B, T, D, *, vmem_budget_bytes, min_grid=2):
    """Largest divisor of B that fits the VMEM budget and keeps grid >= min_grid
    steps (so both of v7x's TensorCores get work along the 'parallel' axis)."""
    fixed, per_b = _vmem_cost(T, D)
    budget = max(vmem_budget_bytes - fixed, per_b)
    best = 1
    for cand in range(1, B + 1):
        if B % cand:
            continue
        if B // cand < min(min_grid, B):
            continue
        if cand * per_b <= budget:
            best = cand
    return best


def multi_head_self_attention(x, wqkv, bqkv, wout, bout, *, num_heads):
    B, T, D = x.shape
    assert D % num_heads == 0, "embed_dim must be divisible by num_heads"
    head_dim = D // num_heads

    cap = _vmem_capacity_bytes()
    budget = int(0.75 * cap)            # headroom for compiler internal scratch
    block_b = _pick_block_b(B, T, D, vmem_budget_bytes=budget)
    grid_b = B // block_b
    M = block_b * T

    kernel = functools.partial(mhsa_kernel, num_heads=num_heads,
                               head_dim=head_dim, block_b=block_b, seq_len=T)

    # Weights -> bf16 for the MXU (halves weight VMEM); biases stay f32 (VPU).
    wqkv_bf = wqkv.astype(jnp.bfloat16)                 # (D, 3D)
    wout_bf = wout.astype(jnp.bfloat16)                 # (D, D)
    bqkv2 = bqkv.reshape(1, 3 * D).astype(jnp.float32)
    bout2 = bout.reshape(1, D).astype(jnp.float32)

    # Present x / out to the kernel as lane-dense (B*T, D) row blocks: no
    # in-kernel reshapes, and the batch/seq merge is free (metadata only).
    x_flat = x.reshape(B * T, D)

    fixed, per_b = _vmem_cost(T, D)
    est = fixed + block_b * per_b
    vmem_limit = int(min(budget, max(32 * 1024 * 1024, int(1.5 * est))))

    out_flat = pl.pallas_call(
        kernel,
        out_shape=jax.ShapeDtypeStruct((B * T, D), x.dtype),
        grid_spec=pltpu.PrefetchScalarGridSpec(
            num_scalar_prefetch=0,
            grid=(grid_b,),
            in_specs=[
                pl.BlockSpec((M, D), lambda i: (i, 0)),
                # Grid-invariant weights: constant block index -> DMA'd once.
                pl.BlockSpec((D, 3 * D), lambda i: (0, 0)),
                pl.BlockSpec((1, 3 * D), lambda i: (0, 0)),
                pl.BlockSpec((D, D), lambda i: (0, 0)),
                pl.BlockSpec((1, D), lambda i: (0, 0)),
            ],
            out_specs=pl.BlockSpec((M, D), lambda i: (i, 0)),
            scratch_shapes=[
                pltpu.VMEM((M, 3 * D), jnp.float32),   # qkv rows
                pltpu.VMEM((M, D), jnp.float32),       # lane-concat head outputs
            ],
        ),
        compiler_params=pltpu.CompilerParams(
            dimension_semantics=("parallel",),
            vmem_limit_bytes=vmem_limit),
    )(x_flat, wqkv_bf, bqkv2, wout_bf, bout2)

    return out_flat.reshape(B, T, D)


def _reference(x, wqkv, bqkv, wout, bout, num_heads):
    """Pure-JAX f32 reference mirroring the PyTorch forward (mask=None)."""
    B, T, D = x.shape
    hd = D // num_heads
    qkv = x @ wqkv + bqkv                                     # (B, T, 3D)
    qkv = qkv.reshape(B, T, 3, num_heads, hd).transpose(2, 0, 3, 1, 4)
    q, k, v = qkv[0], qkv[1], qkv[2]                          # (B, H, T, hd)
    scores = jnp.einsum("bhtd,bhsd->bhts", q, k) / math.sqrt(hd)
    w = jax.nn.softmax(scores, axis=-1)
    out = jnp.einsum("bhts,bhsd->bhtd", w, v)                 # (B, H, T, hd)
    out = out.transpose(0, 2, 1, 3).reshape(B, T, D)
    return out @ wout + bout


if __name__ == "__main__":
    B, T, D = 2, 8, 32
    num_heads = 4

    key = jax.random.PRNGKey(0)
    kx, kw1, kb1, kw2, kb2 = jax.random.split(key, 5)

    x = jax.random.normal(kx, (B, T, D), dtype=jnp.float32)
    # Parameters stored as (in, out); equivalent to PyTorch Linear weight.T
    wqkv = jax.random.normal(kw1, (D, 3 * D), dtype=jnp.float32) * (1.0 / math.sqrt(D))
    bqkv = jax.random.normal(kb1, (3 * D,), dtype=jnp.float32) * 0.02
    wout = jax.random.normal(kw2, (D, D), dtype=jnp.float32) * (1.0 / math.sqrt(D))
    bout = jax.random.normal(kb2, (D,), dtype=jnp.float32) * 0.02

    out = multi_head_self_attention(x, wqkv, bqkv, wout, bout, num_heads=num_heads)
    out = jax.block_until_ready(out)

    ref = _reference(x, wqkv, bqkv, wout, bout, num_heads)
    assert out.shape == (B, T, D)
    # Tolerance loosened vs the f32 reference: bf16 MXU operands + EUP approx
    # reciprocal in the softmax denominator.
    assert jnp.allclose(out, ref, atol=5e-2, rtol=5e-2), "mismatch vs reference"

    print("KERNEL_OK")
</pallas_src>

<mosaic_0001>
module attributes {stable_mosaic.version = 11 : i64} {
  func.func @mhsa_kernel(%arg0: i32, %arg1: memref<8x32xf32, #tpu.memory_space<vmem>>, %arg2: memref<32x96xbf16, #tpu.memory_space<vmem>>, %arg3: memref<1x96xf32, #tpu.memory_space<vmem>>, %arg4: memref<32x32xbf16, #tpu.memory_space<vmem>>, %arg5: memref<1x32xf32, #tpu.memory_space<vmem>>, %arg6: memref<8x32xf32, #tpu.memory_space<vmem>>, %arg7: memref<8x96xf32, #tpu.memory_space<vmem>>, %arg8: memref<8x32xf32, #tpu.memory_space<vmem>>) attributes {dimension_semantics = [#tpu.dimension_semantics<parallel>], iteration_bounds = array<i64: 2>, scalar_prefetch = 0 : i64, scratch_operands = 2 : i64, tpu.core_type = #tpu.core_type<tc>, window_params = [{transform_indices = @transform_0, window_bounds = array<i64: 8, 32>}, {pipeline_mode = #tpu.pipeline_mode<synchronous>, transform_indices = @transform_1, window_bounds = array<i64: 32, 96>}, {pipeline_mode = #tpu.pipeline_mode<synchronous>, transform_indices = @transform_2, window_bounds = array<i64: 1, 96>}, {pipeline_mode = #tpu.pipeline_mode<synchronous>, transform_indices = @transform_3, window_bounds = array<i64: 32, 32>}, {pipeline_mode = #tpu.pipeline_mode<synchronous>, transform_indices = @transform_4, window_bounds = array<i64: 1, 32>}, {transform_indices = @transform_5, window_bounds = array<i64: 8, 32>}]} {
    %c0 = arith.constant 0 : index
    %c0_0 = arith.constant 0 : index
    %0 = vector.load %arg1[%c0, %c0_0] : memref<8x32xf32, #tpu.memory_space<vmem>>, vector<8x32xf32>
    %1 = arith.truncf %0 : vector<8x32xf32> to vector<8x32xbf16>
    %c0_1 = arith.constant 0 : index
    %c0_2 = arith.constant 0 : index
    %2 = vector.load %arg2[%c0_1, %c0_2] : memref<32x96xbf16, #tpu.memory_space<vmem>>, vector<32x96xbf16>
    %cst = arith.constant dense<0.000000e+00> : vector<8x96xf32>
    %3 = tpu.matmul %1, %2, %cst {dimension_numbers = #tpu.dot_dimension_numbers<[1], [0], [0], [1], [0, 0, 1, 1], [], []>} : vector<8x32xbf16>, vector<32x96xbf16>, vector<8x96xf32> -> vector<8x96xf32>
    %c0_3 = arith.constant 0 : index
    %c0_4 = arith.constant 0 : index
    %4 = vector.load %arg3[%c0_3, %c0_4] : memref<1x96xf32, #tpu.memory_space<vmem>>, vector<1x96xf32>
    %5 = vector.shape_cast %4 : vector<1x96xf32> to vector<96xf32>
    %6 = vector.shape_cast %5 : vector<96xf32> to vector<1x96xf32>
    %7 = vector.broadcast %6 : vector<1x96xf32> to vector<8x96xf32>
    %8 = arith.addf %3, %7 : vector<8x96xf32>
    %c0_5 = arith.constant 0 : index
    %c0_6 = arith.constant 0 : index
    %9 = vector.load %arg7[%c0_5, %c0_6] : memref<8x96xf32, #tpu.memory_space<vmem>>, vector<8x96xf32>
    tpu.vector_store %arg7[%c0_5, %c0_6], %8 {strides = array<i32>} : memref<8x96xf32, #tpu.memory_space<vmem>>, vector<8x96xf32>,
    %c0_7 = arith.constant 0 : index
    %c0_8 = arith.constant 0 : index
    %10 = vector.load %arg7[%c0_7, %c0_8] : memref<8x96xf32, #tpu.memory_space<vmem>>, vector<8x96xf32>
    %11 = vector.extract_strided_slice %10 {offsets = [0, 0], sizes = [8, 8], strides = [1, 1]} : vector<8x96xf32> to vector<8x8xf32>
    %cst_9 = arith.constant 0.353553385 : f32
    %12 = vector.broadcast %cst_9 : f32 to vector<8x8xf32>
    %13 = arith.mulf %11, %12 : vector<8x8xf32>
    %14 = arith.truncf %13 : vector<8x8xf32> to vector<8x8xbf16>
    %15 = vector.extract_strided_slice %10 {offsets = [0, 32], sizes = [8, 8], strides = [1, 1]} : vector<8x96xf32> to vector<8x8xf32>
    %16 = arith.truncf %15 : vector<8x8xf32> to vector<8x8xbf16>
    %17 = vector.extract_strided_slice %10 {offsets = [0, 64], sizes = [8, 8], strides = [1, 1]} : vector<8x96xf32> to vector<8x8xf32>
    %18 = arith.truncf %17 : vector<8x8xf32> to vector<8x8xbf16>
    %cst_10 = arith.constant dense<0.000000e+00> : vector<8x8xf32>
    %19 = tpu.matmul %14, %16, %cst_10 {dimension_numbers = #tpu.dot_dimension_numbers<[1], [1], [0], [0], [0, 0, 1, 0], [], []>} : vector<8x8xbf16>, vector<8x8xbf16>, vector<8x8xf32> -> vector<8x8xf32>
    %cst_11 = arith.constant dense<0xFF800000> : vector<8xf32>
    %20 = vector.multi_reduction <maximumf>, %19, %cst_11 [1] : vector<8x8xf32> to vector<8xf32>
    %21 = vector.shape_cast %20 : vector<8xf32> to vector<8x1xf32>
    %22 = vector.broadcast %21 : vector<8x1xf32> to vector<8x8xf32>
    %23 = arith.subf %19, %22 : vector<8x8xf32>
    %24 = math.exp %23 : vector<8x8xf32>
    %cst_12 = arith.constant dense<0.000000e+00> : vector<8xf32>
    %25 = vector.multi_reduction <add>, %24, %cst_12 [1] : vector<8x8xf32> to vector<8xf32>
    %26 = vector.shape_cast %25 : vector<8xf32> to vector<8x1xf32>
    %27 = tpu.reciprocal %26 {approx = true} : vector<8x1xf32> -> vector<8x1xf32>
    %28 = vector.broadcast %27 : vector<8x1xf32> to vector<8x8xf32>
    %29 = arith.mulf %24, %28 : vector<8x8xf32>
    %30 = arith.truncf %29 : vector<8x8xf32> to vector<8x8xbf16>
    %cst_13 = arith.constant dense<0.000000e+00> : vector<8x8xf32>
    %31 = tpu.matmul %30, %18, %cst_13 {dimension_numbers = #tpu.dot_dimension_numbers<[1], [0], [0], [1], [0, 0, 1, 1], [], []>} : vector<8x8xbf16>, vector<8x8xbf16>, vector<8x8xf32> -> vector<8x8xf32>
    %c0_14 = arith.constant 0 : index
    %c0_15 = arith.constant 0 : index
    %32 = vector.load %arg8[%c0_14, %c0_15] : memref<8x32xf32, #tpu.memory_space<vmem>>, vector<8x8xf32>
    tpu.vector_store %arg8[%c0_14, %c0_15], %31 {strides = array<i32>} : memref<8x32xf32, #tpu.memory_space<vmem>>, vector<8x8xf32>,
    %33 = vector.extract_strided_slice %10 {offsets = [0, 8], sizes = [8, 8], strides = [1, 1]} : vector<8x96xf32> to vector<8x8xf32>
    %cst_16 = arith.constant 0.353553385 : f32
    %34 = vector.broadcast %cst_16 : f32 to vector<8x8xf32>
    %35 = arith.mulf %33, %34 : vector<8x8xf32>
    %36 = arith.truncf %35 : vector<8x8xf32> to vector<8x8xbf16>
    %37 = vector.extract_strided_slice %10 {offsets = [0, 40], sizes = [8, 8], strides = [1, 1]} : vector<8x96xf32> to vector<8x8xf32>
    %38 = arith.truncf %37 : vector<8x8xf32> to vector<8x8xbf16>
    %39 = vector.extract_strided_slice %10 {offsets = [0, 72], sizes = [8, 8], strides = [1, 1]} : vector<8x96xf32> to vector<8x8xf32>
    %40 = arith.truncf %39 : vector<8x8xf32> to vector<8x8xbf16>
    %cst_17 = arith.constant dense<0.000000e+00> : vector<8x8xf32>
    %41 = tpu.matmul %36, %38, %cst_17 {dimension_numbers = #tpu.dot_dimension_numbers<[1], [1], [0], [0], [0, 0, 1, 0], [], []>} : vector<8x8xbf16>, vector<8x8xbf16>, vector<8x8xf32> -> vector<8x8xf32>
    %cst_18 = arith.constant dense<0xFF800000> : vector<8xf32>
    %42 = vector.multi_reduction <maximumf>, %41, %cst_18 [1] : vector<8x8xf32> to vector<8xf32>
    %43 = vector.shape_cast %42 : vector<8xf32> to vector<8x1xf32>
    %44 = vector.broadcast %43 : vector<8x1xf32> to vector<8x8xf32>
    %45 = arith.subf %41, %44 : vector<8x8xf32>
    %46 = math.exp %45 : vector<8x8xf32>
    %cst_19 = arith.constant dense<0.000000e+00> : vector<8xf32>
    %47 = vector.multi_reduction <add>, %46, %cst_19 [1] : vector<8x8xf32> to vector<8xf32>
    %48 = vector.shape_cast %47 : vector<8xf32> to vector<8x1xf32>
    %49 = tpu.reciprocal %48 {approx = true} : vector<8x1xf32> -> vector<8x1xf32>
    %50 = vector.broadcast %49 : vector<8x1xf32> to vector<8x8xf32>
    %51 = arith.mulf %46, %50 : vector<8x8xf32>
    %52 = arith.truncf %51 : vector<8x8xf32> to vector<8x8xbf16>
    %cst_20 = arith.constant dense<0.000000e+00> : vector<8x8xf32>
    %53 = tpu.matmul %52, %40, %cst_20 {dimension_numbers = #tpu.dot_dimension_numbers<[1], [0], [0], [1], [0, 0, 1, 1], [], []>} : vector<8x8xbf16>, vector<8x8xbf16>, vector<8x8xf32> -> vector<8x8xf32>
    %c0_21 = arith.constant 0 : index
    %c8 = arith.constant 8 : index
    %54 = vector.load %arg8[%c0_21, %c8] : memref<8x32xf32, #tpu.memory_space<vmem>>, vector<8x8xf32>
    tpu.vector_store %arg8[%c0_21, %c8], %53 {strides = array<i32>} : memref<8x32xf32, #tpu.memory_space<vmem>>, vector<8x8xf32>,
    %55 = vector.extract_strided_slice %10 {offsets = [0, 16], sizes = [8, 8], strides = [1, 1]} : vector<8x96xf32> to vector<8x8xf32>
    %cst_22 = arith.constant 0.353553385 : f32
    %56 = vector.broadcast %cst_22 : f32 to vector<8x8xf32>
    %57 = arith.mulf %55, %56 : vector<8x8xf32>
    %58 = arith.truncf %57 : vector<8x8xf32> to vector<8x8xbf16>
    %59 = vector.extract_strided_slice %10 {offsets = [0, 48], sizes = [8, 8], strides = [1, 1]} : vector<8x96xf32> to vector<8x8xf32>
    %60 = arith.truncf %59 : vector<8x8xf32> to vector<8x8xbf16>
    %61 = vector.extract_strided_slice %10 {offsets = [0, 80], sizes = [8, 8], strides = [1, 1]} : vector<8x96xf32> to vector<8x8xf32>
    %62 = arith.truncf %61 : vector<8x8xf32> to vector<8x8xbf16>
    %cst_23 = arith.constant dense<0.000000e+00> : vector<8x8xf32>
    %63 = tpu.matmul %58, %60, %cst_23 {dimension_numbers = #tpu.dot_dimension_numbers<[1], [1], [0], [0], [0, 0, 1, 0], [], []>} : vector<8x8xbf16>, vector<8x8xbf16>, vector<8x8xf32> -> vector<8x8xf32>
    %cst_24 = arith.constant dense<0xFF800000> : vector<8xf32>
    %64 = vector.multi_reduction <maximumf>, %63, %cst_24 [1] : vector<8x8xf32> to vector<8xf32>
    %65 = vector.shape_cast %64 : vector<8xf32> to vector<8x1xf32>
    %66 = vector.broadcast %65 : vector<8x1xf32> to vector<8x8xf32>
    %67 = arith.subf %63, %66 : vector<8x8xf32>
    %68 = math.exp %67 : vector<8x8xf32>
    %cst_25 = arith.constant dense<0.000000e+00> : vector<8xf32>
    %69 = vector.multi_reduction <add>, %68, %cst_25 [1] : vector<8x8xf32> to vector<8xf32>
    %70 = vector.shape_cast %69 : vector<8xf32> to vector<8x1xf32>
    %71 = tpu.reciprocal %70 {approx = true} : vector<8x1xf32> -> vector<8x1xf32>
    %72 = vector.broadcast %71 : vector<8x1xf32> to vector<8x8xf32>
    %73 = arith.mulf %68, %72 : vector<8x8xf32>
    %74 = arith.truncf %73 : vector<8x8xf32> to vector<8x8xbf16>
    %cst_26 = arith.constant dense<0.000000e+00> : vector<8x8xf32>
    %75 = tpu.matmul %74, %62, %cst_26 {dimension_numbers = #tpu.dot_dimension_numbers<[1], [0], [0], [1], [0, 0, 1, 1], [], []>} : vector<8x8xbf16>, vector<8x8xbf16>, vector<8x8xf32> -> vector<8x8xf32>
    %c0_27 = arith.constant 0 : index
    %c16 = arith.constant 16 : index
    %76 = vector.load %arg8[%c0_27, %c16] : memref<8x32xf32, #tpu.memory_space<vmem>>, vector<8x8xf32>
    tpu.vector_store %arg8[%c0_27, %c16], %75 {strides = array<i32>} : memref<8x32xf32, #tpu.memory_space<vmem>>, vector<8x8xf32>,
    %77 = vector.extract_strided_slice %10 {offsets = [0, 24], sizes = [8, 8], strides = [1, 1]} : vector<8x96xf32> to vector<8x8xf32>
    %cst_28 = arith.constant 0.353553385 : f32
    %78 = vector.broadcast %cst_28 : f32 to vector<8x8xf32>
    %79 = arith.mulf %77, %78 : vector<8x8xf32>
    %80 = arith.truncf %79 : vector<8x8xf32> to vector<8x8xbf16>
    %81 = vector.extract_strided_slice %10 {offsets = [0, 56], sizes = [8, 8], strides = [1, 1]} : vector<8x96xf32> to vector<8x8xf32>
    %82 = arith.truncf %81 : vector<8x8xf32> to vector<8x8xbf16>
    %83 = vector.extract_strided_slice %10 {offsets = [0, 88], sizes = [8, 8], strides = [1, 1]} : vector<8x96xf32> to vector<8x8xf32>
    %84 = arith.truncf %83 : vector<8x8xf32> to vector<8x8xbf16>
    %cst_29 = arith.constant dense<0.000000e+00> : vector<8x8xf32>
    %85 = tpu.matmul %80, %82, %cst_29 {dimension_numbers = #tpu.dot_dimension_numbers<[1], [1], [0], [0], [0, 0, 1, 0], [], []>} : vector<8x8xbf16>, vector<8x8xbf16>, vector<8x8xf32> -> vector<8x8xf32>
    %cst_30 = arith.constant dense<0xFF800000> : vector<8xf32>
    %86 = vector.multi_reduction <maximumf>, %85, %cst_30 [1] : vector<8x8xf32> to vector<8xf32>
    %87 = vector.shape_cast %86 : vector<8xf32> to vector<8x1xf32>
    %88 = vector.broadcast %87 : vector<8x1xf32> to vector<8x8xf32>
    %89 = arith.subf %85, %88 : vector<8x8xf32>
    %90 = math.exp %89 : vector<8x8xf32>
    %cst_31 = arith.constant dense<0.000000e+00> : vector<8xf32>
    %91 = vector.multi_reduction <add>, %90, %cst_31 [1] : vector<8x8xf32> to vector<8xf32>
    %92 = vector.shape_cast %91 : vector<8xf32> to vector<8x1xf32>
    %93 = tpu.reciprocal %92 {approx = true} : vector<8x1xf32> -> vector<8x1xf32>
    %94 = vector.broadcast %93 : vector<8x1xf32> to vector<8x8xf32>
    %95 = arith.mulf %90, %94 : vector<8x8xf32>
    %96 = arith.truncf %95 : vector<8x8xf32> to vector<8x8xbf16>
    %cst_32 = arith.constant dense<0.000000e+00> : vector<8x8xf32>
    %97 = tpu.matmul %96, %84, %cst_32 {dimension_numbers = #tpu.dot_dimension_numbers<[1], [0], [0], [1], [0, 0, 1, 1], [], []>} : vector<8x8xbf16>, vector<8x8xbf16>, vector<8x8xf32> -> vector<8x8xf32>
    %c0_33 = arith.constant 0 : index
    %c24 = arith.constant 24 : index
    %98 = vector.load %arg8[%c0_33, %c24] : memref<8x32xf32, #tpu.memory_space<vmem>>, vector<8x8xf32>
    tpu.vector_store %arg8[%c0_33, %c24], %97 {strides = array<i32>} : memref<8x32xf32, #tpu.memory_space<vmem>>, vector<8x8xf32>,
    %c0_34 = arith.constant 0 : index
    %c0_35 = arith.constant 0 : index
    %99 = vector.load %arg8[%c0_34, %c0_35] : memref<8x32xf32, #tpu.memory_space<vmem>>, vector<8x32xf32>
    %100 = arith.truncf %99 : vector<8x32xf32> to vector<8x32xbf16>
    %c0_36 = arith.constant 0 : index
    %c0_37 = arith.constant 0 : index
    %101 = vector.load %arg4[%c0_36, %c0_37] : memref<32x32xbf16, #tpu.memory_space<vmem>>, vector<32x32xbf16>
    %cst_38 = arith.constant dense<0.000000e+00> : vector<8x32xf32>
    %102 = tpu.matmul %100, %101, %cst_38 {dimension_numbers = #tpu.dot_dimension_numbers<[1], [0], [0], [1], [0, 0, 1, 1], [], []>} : vector<8x32xbf16>, vector<32x32xbf16>, vector<8x32xf32> -> vector<8x32xf32>
    %c0_39 = arith.constant 0 : index
    %c0_40 = arith.constant 0 : index
    %103 = vector.load %arg5[%c0_39, %c0_40] : memref<1x32xf32, #tpu.memory_space<vmem>>, vector<1x32xf32>
    %104 = vector.shape_cast %103 : vector<1x32xf32> to vector<32xf32>
    %105 = vector.shape_cast %104 : vector<32xf32> to vector<1x32xf32>
    %106 = vector.broadcast %105 : vector<1x32xf32> to vector<8x32xf32>
    %107 = arith.addf %102, %106 : vector<8x32xf32>
    %c0_41 = arith.constant 0 : index
    %c0_42 = arith.constant 0 : index
    %108 = vector.load %arg6[%c0_41, %c0_42] : memref<8x32xf32, #tpu.memory_space<vmem>>, vector<8x32xf32>
    tpu.vector_store %arg6[%c0_41, %c0_42], %107 {strides = array<i32>} : memref<8x32xf32, #tpu.memory_space<vmem>>, vector<8x32xf32>,
    return
  }
  func.func @transform_0(%arg0: i32) -> (i32, i32) {
    %c0_i32 = arith.constant 0 : i32
    %c0_i32_0 = arith.constant 0 : i32
    return %arg0, %c0_i32 : i32, i32
  }
  func.func @transform_1(%arg0: i32) -> (i32, i32) {
    %c0_i32 = arith.constant 0 : i32
    %c0_i32_0 = arith.constant 0 : i32
    %c0_i32_1 = arith.constant 0 : i32
    return %c0_i32, %c0_i32_0 : i32, i32
  }
  func.func @transform_2(%arg0: i32) -> (i32, i32) {
    %c0_i32 = arith.constant 0 : i32
    %c0_i32_0 = arith.constant 0 : i32
    %c0_i32_1 = arith.constant 0 : i32
    return %c0_i32, %c0_i32_0 : i32, i32
  }
  func.func @transform_3(%arg0: i32) -> (i32, i32) {
    %c0_i32 = arith.constant 0 : i32
    %c0_i32_0 = arith.constant 0 : i32
    %c0_i32_1 = arith.constant 0 : i32
    return %c0_i32, %c0_i32_0 : i32, i32
  }
  func.func @transform_4(%arg0: i32) -> (i32, i32) {
    %c0_i32 = arith.constant 0 : i32
    %c0_i32_0 = arith.constant 0 : i32
    %c0_i32_1 = arith.constant 0 : i32
    return %c0_i32, %c0_i32_0 : i32, i32
  }
  func.func @transform_5(%arg0: i32) -> (i32, i32) {
    %c0_i32 = arith.constant 0 : i32
    %c0_i32_0 = arith.constant 0 : i32
    return %arg0, %c0_i32 : i32, i32
  }
}

</mosaic_0001>

<bundles_post_ra>
// kernel: tpu_custom_call.1
= control target key start
LH: loop header
LB: loop body
LE: loop exit
PB: predicated region body
PF: predicated region fallthrough
CT: control target
= control target key end

     0   :  { %10 = vsyncpa [#allocation5], 0  ;;  %s1260_s0 = inlined_call_operand.hbm [shape: f32[16,32], index: 0, kind: input, shape index: {}]   ;;  %s1261_s1 = inlined_call_operand.hbm [shape: bf16[32,96], index: 1, kind: input, shape index: {}]   ;;  %s1262_s2 = inlined_call_operand.vmem [shape: f32[1,96], index: 2, kind: input, shape index: {}]   ;;  %s1263_s3 = inlined_call_operand.hbm [shape: bf16[32,32], index: 3, kind: input, shape index: {}]   ;;  %s1264_s4 = inlined_call_operand.vmem [shape: f32[1,32], index: 4, kind: input, shape index: {}]   ;;  %s1265_s5 = inlined_call_operand.hbm [shape: f32[16,32], index: 5, kind: output, shape index: {}]  }
   0x1   :  { %12 = vsyncpa [#allocation5 + $0x1], 0 }
   0x2   :  { %13 = vsyncpa [#allocation8], 0 }
   0x3   :  { %14 = vsyncpa [#allocation6], 0 }
   0x4   :  { %16 = vsyncpa [#allocation6 + $0x1], 0  ;;  %s1067_s18 = smov 0   ;;  %s1069_s19 = smov 0  }
   0x5   :  { %s1071_s20 = smov 0   ;;  %s1073_s21 = smov 0  }
   0x6 LB: > { %s174_s24 = sshll.u32 %s1261_s1, 4  ;;  %s1091_s25 = sadd.s32 4294967295, %s1017_s21   ;;  %s1017_s21 = sphi %s1073_s21, %s1276_s21   ;;  %s1013_s20 = sphi %s1071_s20, %s1275_s20   ;;  %s1009_s19 = sphi %s1069_s19, %s1274_s19   ;;  %s1005_s18 = sphi %s1067_s18, %s1273_s18   ;;  %s175_s24 = int_to_ptr.hbm [resolvable:$true] %s174_s24 }
   0x7   : > { %p711_p0 = scmp.ge.s32.totalorder %s1017_s21, 1  ;;  %p43_p1 = scmp.eq.s32.totalorder %s1091_s25, 0 }
   0x8   : > { %p163_p2 = scmp.lt.s32.totalorder %s1017_s21, 3  ;;  %s1019_s27 = smov [#allocation7]  }
   0x9   : > { %s176_s28 = sshll.u32 %s1019_s27, 4  ;;  %s191_s6 = sshll.u32 %s1263_s3, 4  ;;  %s177_s28 = int_to_ptr.vmem [resolvable:$true] %s176_s28  ;;  %s192_s6 = int_to_ptr.hbm [resolvable:$true] %s191_s6 }
   0xa   : > { %p1096_p3 = pnand %p711_p0, %p163_p2  ;;  %s1020_s7 = smov [#allocation9]  }
   0xb   : > { %s193_s8 = sshll.u32 %s1020_s7, 4  ;;  %s1021_s9 = smov 64   ;;  %s194_s8 = int_to_ptr.vmem [resolvable:$true] %s193_s8 }
   0xc   : > { %p768_p4 = pneg %p1096_p3  ;;  %s1022_s10 = smov 4  }
   0xd   : > { %s710_s11 = sadd.s32 4294967294, %s1017_s21   ;;  %s1110_s12 = sadd.s32 1, %s1017_s21  }
   0xe   : > { %p769_p6 = pnand %p768_p4, %p43_p1  ;;  %s26_s13 = ssub.s32 %s1017_s21, %s1110_s12 }
   0xf   : > { %s29_s14 = sadd.s32 1, %s1013_s20  ;;  %p27_p7 = scmp.eq.s32.totalorder %s26_s13, 0 }
  0x10   : > { %771 = dma.hbm_to_vmem [thread:$0]  (!%p769_p6), %s175_s24, 256, %s177_s28, [#allocation8], %s1021_s9, %s1021_s9, %s1022_s10  }
  0x11   : > { %774 = dma.hbm_to_vmem [thread:$0]  (!%p769_p6), %s192_s6, 256, %s194_s8, [#allocation8], %s1021_s9, %s1021_s9, %s1022_s10  }
  0x12   : > { %p36_p8 = scmp.ne.s32.totalorder %s1013_s20, %s1009_s19  ;;  %p37_p9 = scmp.eq.s32.totalorder %s1017_s21, 0 }
  0x13   : > { %p42_p10 = scmp.ne.s32.totalorder %s1009_s19, %s1005_s18  ;;  %p150_p13 = scmp.eq.s32.totalorder %s1091_s25, 1 }
  0x14   : > { %s1121_s15 = scalar_select %p27_p7, %s1013_s20, %s29_s14  }
  0x15   : > { %p1123_p11 = por %p37_p9, %p36_p8  ;;  %p1129_p12 = por %p43_p1, %p42_p10 }
  0x16   : > { %p156_p0 = scmp.eq.s32.totalorder %s710_s11, 1  ;;  %p785_p2 = scmp.lt.s32.totalorder %s1017_s21, 2 }
  0x17   : > { %s210_s22 = sand.u32 1, %s1013_s20   ;;  %p1136_p4 = por %p150_p13, %p36_p8 }
  0x18   : > { %p1140_p6 = por %p156_p0, %p42_p10  ;;  %s715_s27 = sshll.u32 %s210_s22, 3 }
  0x19   : > { %s716_s28 = sshll.u32 %s1017_s21, 3  ;;  %s214_s7 = scalar_lea.vmem [#allocation4], %s715_s27 }
  0x1a   : > { %s218_s6 = scalar_lea.hbm %s1260_s0, %s716_s28  ;;  %s222_s8 = sshll.u32 %s214_s7, 4  ;;  %s223_s8 = int_to_ptr.vmem [resolvable:$true] %s222_s8 }
  0x1b   : > { %s220_s9 = sshll.u32 %s218_s6, 4  ;;  %p1150_p7 = pnand %p785_p2, %p1123_p11  ;;  %s221_s9 = int_to_ptr.hbm [resolvable:$true] %s220_s9 }
  0x1c   : > { %s211_s11 = scalar_lea.sflag [#allocation5], %s210_s22  ;;  %s917_s13 = sshra.s32 %s221_s9, 4  ;;  %s918_s13 = int_to_ptr.hbm [resolvable:$true] %s917_s13 }
  0x1d   : > { %s919_s14 = scalar_lea.hbm %s918_s13, 8  ;;  %p921_p9 = pneg %p1150_p7 }
  0x1e   : > { %p920_p8 = scmp.ne.s32.totalorder %s918_s13, %s919_s14  ;;  %s924_s29 = scalar_lea.hbm %s1260_s0, 16 }
  0x1f   : > { %p925_p11 = scmp.lt.s32.totalorder %s918_s13, %s1260_s0  ;;  %p926_p0 = scmp.lt.s32.totalorder %s924_s29, %s919_s14 }
  0x20   : > { %p922_p10 = pnand %p921_p9, %p920_p8 }
  0x21   : > { %p927_p2 = por %p926_p0, %p925_p11 }
  0x22   : > { %p923_p13 = pneg %p922_p10 }
  0x24   : > { %p928_p5 = pnand %p927_p2, %p923_p13 }
  0x26   : > { %931 = shalt.err (!%p928_p5)
}
  0x27   : > { %778 = dma.hbm_to_vmem [thread:$0]  (!%p1150_p7), %s221_s9, 128, %s223_s8, %s211_s11  }
  0x28   : > { %231 = sbr.rel (%p1096_p3) target bundleno = 1136 (0x470), region = 40  ;;  %s1167_s22 = sand.u32 (!%p1096_p3), 1, %s1009_s19  }
  0x29   : > { %s718_s6 = sshll.u32 (!%p1096_p3), %s1167_s22, 3  ;;  %s234_s7 = scalar_lea.sflag (!%p1096_p3), [#allocation5], %s1167_s22 }
  0x2a   : > { %s237_s13 = scalar_lea.vmem (!%p1096_p3), [#allocation4], %s718_s6 }
  0x2d   : > { %992 = dma.done.wait (%p1129_p12), %s234_s7, 128  }
  0x2e   : > { %994 = vsyncadd (%p1129_p12), %s234_s7, 4294967168 }
  0x2f   : > { %996 = dma.done.wait (%p43_p1), [#allocation8], 512  }
  0x30   : > { %998 = vsyncadd (%p43_p1), [#allocation8], 4294966784  ;;  %v753_v0 = vld [vmem:[#allocation7 + $0x8] sm:$0xff]  ;;  %v752_v1 = vld [vmem:[#allocation7] sm:$0xff]  ;;  %vm298_vm0 = vcmask 261120   ;;  %vm315_vm1 = vcmask 785408  }
  0x31   : > { %308 = vmatpush.bf16.msra.mxu0 %v753_v0  ;;  %v276_v2 = vld [vmem:[%s237_s13] sm:$0xff]  ;;  %v839_v4 = vld [vmem:[%s1262_s2] ss:$0 sm:$0xff]  ;;  %s1023_s17 = smov 96   ;;  %s1024_s9 = smov 104   ;;  %vm324_vm2 = vcmask 64512  }
  0x32   : > { %v277_v3 = vpack.c.bf16 %v276_v2, %v276_v2  ;;  %s1025_s10 = smov 120   ;;  %s1026_s11 = smov 88   ;;  %vm361_vm3 = vcmask 1043456   ;;  %vm440_vm4 = vcmask 130112   ;;  %vm502_vm5 = vcmask 195712  }
  0x33   : > { %s1027_s14 = smov 80   ;;  %s1028_s27 = smov 72   ;;  %vm564_vm6 = vcmask 261312  }
  0x34   : > { %s1029_s28 = smov 112   ;;  %s1030_s29 = smov 64  }
  0x35   : > { %309 = vmatpush.bf16.msra.mxu0 %v752_v1  ;;  %s1031_s30 = smov 40   ;;  %s1032_s16 = smov 56  }
  0x36   : > { %s1033_s7 = smov 48   ;;  %s1034_s13 = smov 8  }
  0x37   : > { %s1035_s26 = smov 16   ;;  %s1036_s8 = smov 24  }
  0x38   : > { %730 = vmatmul.msk.bf16.vlgmr.msra.gmra.mxu0 %vm298_vm0, %v277_v3 }
  0xb5   : > { %v311_v5 = vpop.f32.mrf.mxu0 }
  0xb6   : > { %v312_v6 = vadd.f32 %v839_v4, %v311_v5 }
  0xb8   : > { %316 = vst.msk [vmem:[#allocation2] sm:$0xff] %vm315_vm1, %v312_v6 }
  0xbd   : > { %v313_v7 = vpop.f32.mrf.mxu0 }
  0xbf   : > { %v317_v8 = vld [vmem:[#allocation2] sm:$0xff] }
  0xc0   : > { %v1185_v9 = vpack.c.bf16 %v317_v8, %v317_v8  ;;  %v318_v10 = vmul.f32 0.35355338, %v317_v8 }
  0xc2   : > { %322 = vrot.lane.b32.xlu0 %v1185_v9, %s1023_s17  ;;  %v319_v11 = vpack.c.bf16 %v318_v10, %v318_v10  ;;  %s749_s17 = sshll.u32 %s1091_s25, 3  ;;  %s606_s25 = scalar_lea.sflag [#allocation6], %s1167_s22 }
  0xc4   : > { %504 = vrot.lane.b32.xlu2 %v319_v11, %s1024_s9  ;;  %380 = vrot.lane.b32.xlu1 %v319_v11, %s1025_s10 }
  0xca   : > { %382 = vrot.lane.b32.xlu0 %v1185_v9, %s1026_s11  ;;  %s616_s11 = scalar_lea.hbm %s1265_s5, %s749_s17 }
  0xcc   : > { %444 = vrot.lane.b32.xlu2 %v1185_v9, %s1027_s14  ;;  %506 = vrot.lane.b32.xlu1 %v1185_v9, %s1028_s27 }
  0xd2   : > { %442 = vrot.lane.b32.xlu0 %v319_v11, %s1029_s28  ;;  %s274_s28 = scalar_lea.vmem [#allocation10], %s718_s6  ;;  %s967_s6 = scalar_lea.hbm %s1265_s5, 16 }
 0x11e   : > { %v505_v12 = vpop.permute.xlu2 %504 }
 0x126   : > { %v445_v13 = vpop.permute.xlu2 %444 }
 0x127   : > { %v450_v14 = vsel %vm324_vm2, %v445_v13, 0 }
 0x128   : > { %459 = vmatpush.bf16.xpose.msrb.mxu0 %v450_v14 }
 0x134   : > { %v323_v15 = vpop.permute.xlu0 %322 }
 0x135   : > { %v329_v16 = vsel %vm324_vm2, %v323_v15, 0 }
 0x136   : > { %338 = vmatpush.bf16.xpose.msra.mxu1 %v329_v16  ;;  %v381_v17 = vpop.permute.xlu1 %380 }
 0x13c   : > { %v383_v18 = vpop.permute.xlu0 %382 }
 0x13d   : > { %731 = vmatmul.msk.bf16.vlgmr.msra.gmra.mxu1 %vm324_vm2, %v319_v11  ;;  %v388_v19 = vsel %vm324_vm2, %v383_v18, 0 }
 0x13e   : > { %397 = vmatpush.bf16.xpose.msra.mxu3 %v388_v19  ;;  %v507_v20 = vpop.permute.xlu1 %506 }
 0x13f   : > { %v512_v21 = vsel %vm324_vm2, %v507_v20, 0 }
 0x144   : > { %v443_v22 = vpop.permute.xlu0 %442 }
 0x145   : > { %733 = vmatmul.msk.bf16.vlgmr.msra.gmra.mxu3 %vm324_vm2, %v381_v17  ;;  %735 = vmatmul.msk.bf16.vlgmr.msrb.gmra.mxu0 %vm324_vm2, %v443_v22 }
 0x146   : > { %521 = vmatpush.bf16.xpose.msrb.mxu3 %v512_v21 }
 0x155   : > { %737 = vmatmul.msk.bf16.vlgmr.msrb.gmra.mxu3 %vm324_vm2, %v505_v12 }
 0x1ba   : > { %v340_v23 = vpop.f32.mrf.mxu1 }
 0x1bb   : > { %v344_v24 = vsel %vm324_vm2, %v340_v23, -inf }
 0x1bc   : > { %345 = vmax.xlane.f32.xlu1 %v344_v24  ;;  %v754_v24 = vld [vmem:[#allocation9] sm:$0xff] }
 0x1c2   : > { %v342_v25 = vpop.f32.mrf.mxu1  ;;  %v461_v26 = vpop.f32.mrf.mxu0 }
 0x1c3   : > { %v465_v31 = vsel %vm324_vm2, %v461_v26, -inf }
 0x1c8   : > { %v399_v27 = vpop.f32.mrf.mxu3 }
 0x1c9   : > { %v403_v28 = vsel %vm324_vm2, %v399_v27, -inf }
 0x1ca   : > { %v463_v29 = vpop.f32.mrf.mxu0  ;;  %404 = vmax.xlane.f32.xlu2 %v403_v28 }
 0x1d0   : > { %v401_v30 = vpop.f32.mrf.mxu3 }
 0x1d1   : > { %v840_v30 = vld [vmem:[%s1264_s4] ss:$0 sm:$0xff] }
 0x1d2   : > { %466 = vmax.xlane.f32.xlu2 %v465_v31 }
 0x1d8   : > { %v523_v32 = vpop.f32.mrf.mxu3 }
 0x1d9   : > { %v527_v33 = vsel %vm324_vm2, %v523_v32, -inf }
 0x1da   : > { %528 = vmax.xlane.f32.xlu0 %v527_v33 }
 0x1e0   : > { %v525_v34 = vpop.f32.mrf.mxu3 }
 0x1ea   : > { %356 = vrot.lane.b32.xlu2 %v1185_v9, %s1030_s29  ;;  %s618_s29 = sshll.u32 %s274_s28, 4  ;;  %s619_s29 = int_to_ptr.vmem [resolvable:$true] %s618_s29 }
 0x1f2   : > { %539 = vrot.lane.b32.xlu2 %v1185_v9, %s1031_s30  ;;  %s620_s30 = sshll.u32 %s616_s11, 4  ;;  %s621_s30 = int_to_ptr.hbm [resolvable:$true] %s620_s30 }
 0x22f   : > { %v346_v35 = vpop.xlane.xlu1 %345 }
 0x230   : > { %v347_v36 = vsub.f32 %v340_v23, %v346_v35  ;;  %v755_v23 = vld [vmem:[#allocation9 + $0x8] sm:$0xff] }
 0x231   : > { %597 = vmatpush.bf16.msra.mxu0 %v755_v23 }
 0x232   : > { %v348_v37 = vmul.f32 1.442695, %v347_v36 }
 0x234   : > { %841 = vpow2.f32 %v348_v37 }
 0x235   : > { %598 = vmatpush.bf16.msra.mxu0 %v754_v24 }
 0x23a   : > { %v842_v38 = vpop.eup %841 }
 0x23b   : > { %v350_v39 = vsel %vm324_vm2, %v842_v38, 0.0 }
 0x23c   : > { %351 = vadd.xlane.f32.xlu1 %v350_v39 }
 0x23d   : > { %v405_v40 = vpop.xlane.xlu2 %404 }
 0x23e   : > { %v406_v43 = vsub.f32 %v399_v27, %v405_v40 }
 0x240   : > { %v407_v45 = vmul.f32 1.442695, %v406_v43 }
 0x245   : > { %v467_v41 = vpop.xlane.xlu2 %466 }
 0x246   : > { %v468_v42 = vsub.f32 %v461_v26, %v467_v41 }
 0x248   : > { %v469_v44 = vmul.f32 1.442695, %v468_v42 }
 0x24a   : > { %843 = vpow2.f32 %v469_v44 }
 0x24b   : > { %845 = vpow2.f32 %v407_v45 }
 0x24d   : > { %v357_v46 = vpop.permute.xlu2 %356  ;;  %v529_v47 = vpop.xlane.xlu0 %528 }
 0x24e   : > { %v363_v48 = vsel %vm361_vm3, %v357_v46, 0  ;;  %v530_v50 = vsub.f32 %v523_v32, %v529_v47 }
 0x24f   : > { %372 = vmatpush.bf16.msra.mxu2 %v363_v48 }
 0x250   : > { %v844_v49 = vpop.eup %843  ;;  %v531_v52 = vmul.f32 1.442695, %v530_v50 }
 0x251   : > { %v471_v51 = vsel %vm324_vm2, %v844_v49, 0.0  ;;  %v846_v53 = vpop.eup %845 }
 0x252   : > { %472 = vadd.xlane.f32.xlu0 %v471_v51  ;;  %847 = vpow2.f32 %v531_v52  ;;  %v409_v54 = vsel %vm324_vm2, %v846_v53, 0.0 }
 0x255   : > { %415 = vrot.lane.b32.xlu1 %v1185_v9, %s1032_s16  ;;  %v540_v62 = vpop.permute.xlu2 %539  ;;  %s961_s16 = sshra.s32 %s621_s30, 4  ;;  %s962_s16 = int_to_ptr.hbm [resolvable:$true] %s961_s16 }
 0x256   : > { %v545_v1 = vsel %vm361_vm3, %v540_v62, 0  ;;  %p968_p12 = scmp.lt.s32.totalorder %s962_s16, %s1265_s5 }
 0x258   : > { %v848_v55 = vpop.eup %847 }
 0x259   : > { %v533_v56 = vsel %vm324_vm2, %v848_v55, 0.0 }
 0x25a   : > { %410 = vadd.xlane.f32.xlu0 %v409_v54 }
 0x262   : > { %534 = vadd.xlane.f32.xlu0 %v533_v56 }
 0x276   : > { %477 = vrot.lane.b32.xlu0 %v1185_v9, %s1033_s7  ;;  %s963_s7 = scalar_lea.hbm %s962_s16, 8 }
 0x277   : > { %p964_p1 = scmp.ne.s32.totalorder %s962_s16, %s963_s7  ;;  %p969_p7 = scmp.lt.s32.totalorder %s967_s6, %s963_s7 }
 0x279   : > { %p965_p3 = pnand %p964_p1, %p1136_p4  ;;  %p970_p8 = por %p969_p7, %p968_p12 }
 0x27b   : > { %p966_p5 = pneg %p965_p3 }
 0x27d   : > { %p971_p9 = pnand %p970_p8, %p966_p5 }
 0x2af   : > { %v352_v57 = vpop.xlane.xlu1 %351 }
 0x2b0   : > { %849 = vrcp.f32 %v352_v57 }
 0x2b6   : > { %v850_v58 = vpop.eup %849 }
 0x2b7   : > { %v354_v59 = vmul.f32 %v850_v58, %v842_v38 }
 0x2b9   : > { %v355_v60 = vpack.c.bf16 %v354_v59, %v354_v59 }
 0x2bb   : > { %732 = vmatmul.msk.bf16.vlgmr.msra.gmra.mxu2 %vm324_vm2, %v355_v60 }
 0x2c5   : > { %v473_v61 = vpop.xlane.xlu0 %472 }
 0x2c7   : > { %v416_v63 = vpop.permute.xlu1 %415 }
 0x2c8   : > { %v421_v0 = vsel %vm361_vm3, %v416_v63, 0 }
 0x2c9   : > { %430 = vmatpush.bf16.msrb.mxu2 %v421_v0 }
 0x2cd   : > { %554 = vmatpush.bf16.msra.mxu2 %v545_v1  ;;  %v411_v2 = vpop.xlane.xlu0 %410 }
 0x2ce   : > { %851 = vrcp.f32 %v411_v2 }
 0x2d4   : > { %v852_v3 = vpop.eup %851 }
 0x2d5   : > { %v413_v4 = vmul.f32 %v852_v3, %v846_v53  ;;  %v535_v5 = vpop.xlane.xlu0 %534 }
 0x2d6   : > { %853 = vrcp.f32 %v535_v5 }
 0x2d7   : > { %v414_v6 = vpack.c.bf16 %v413_v4, %v413_v4  ;;  %855 = vrcp.f32 %v473_v61 }
 0x2d9   : > { %734 = vmatmul.msk.bf16.vlgmr.msrb.gmra.mxu2 %vm324_vm2, %v414_v6 }
 0x2dc   : > { %v854_v7 = vpop.eup %853 }
 0x2dd   : > { %v537_v8 = vmul.f32 %v854_v7, %v848_v55  ;;  %v856_v9 = vpop.eup %855 }
 0x2de   : > { %v475_v10 = vmul.f32 %v856_v9, %v844_v49 }
 0x2df   : > { %v538_v11 = vpack.c.bf16 %v537_v8, %v537_v8 }
 0x2e0   : > { %v476_v14 = vpack.c.bf16 %v475_v10, %v475_v10 }
 0x2e8   : > { %v478_v12 = vpop.permute.xlu0 %477 }
 0x2e9   : > { %738 = vmatmul.msk.bf16.vlgmr.msra.gmra.mxu2 %vm324_vm2, %v538_v11  ;;  %v483_v13 = vsel %vm361_vm3, %v478_v12, 0 }
 0x2ea   : > { %492 = vmatpush.bf16.msrb.mxu1 %v483_v13 }
 0x2ed   : > { %736 = vmatmul.msk.bf16.vlgmr.msrb.gmra.mxu1 %vm324_vm2, %v476_v14 }
 0x33e   : > { %v374_v15 = vpop.f32.mrf.mxu2 }
 0x33f   : > { %378 = vst.msk [vmem:[#allocation3] sm:$0xff] %vm324_vm2, %v374_v15 }
 0x346   : > { %v376_v16 = vpop.f32.mrf.mxu2 }
 0x35c   : > { %v432_v17 = vpop.f32.mrf.mxu2 }
 0x35d   : > { %437 = vrot.lane.b32.xlu1 %v432_v17, %s1034_s13 }
 0x364   : > { %v434_v18 = vpop.f32.mrf.mxu2 }
 0x36a   : > { %v494_v19 = vpop.f32.mrf.mxu1 }
 0x36b   : > { %499 = vrot.lane.b32.xlu2 %v494_v19, %s1035_s26 }
 0x36c   : > { %v556_v20 = vpop.f32.mrf.mxu2 }
 0x36d   : > { %561 = vrot.lane.b32.xlu1 %v556_v20, %s1036_s8 }
 0x372   : > { %v496_v21 = vpop.f32.mrf.mxu1 }
 0x374   : > { %v558_v22 = vpop.f32.mrf.mxu2 }
 0x3c5   : > { %v500_v26 = vpop.permute.xlu2 %499 }
 0x3cf   : > { %v438_v25 = vpop.permute.xlu1 %437 }
 0x3d0   : > { %441 = vst.msk [vmem:[#allocation3] sm:$0xff] %vm440_vm4, %v438_v25 }
 0x3d1   : > { %503 = vst.msk [vmem:[#allocation3] sm:$0xff] %vm502_vm5, %v500_v26 }
 0x3df   : > { %v562_v27 = vpop.permute.xlu1 %561 }
 0x3e0   : > { %565 = vst.msk [vmem:[#allocation3] sm:$0xff] %vm564_vm6, %v562_v27 }
 0x3e7   : > { %v566_v28 = vld [vmem:[#allocation3] sm:$0xff] }
 0x3e8   : > { %v567_v29 = vpack.c.bf16 %v566_v28, %v566_v28 }
 0x3ea   : > { %747 = vmatmul.msk.bf16.vlgmr.msra.gmra.mxu0 %vm298_vm0, %v567_v29 }
 0x467   : > { %v600_v31 = vpop.f32.mrf.mxu0 }
 0x468   : > { %v601_v32 = vadd.f32 %v840_v30, %v600_v31 }
 0x46a   : > { %604 = vst.msk [vmem:[%s274_s28] sm:$0xff] %vm298_vm0, %v601_v32 }
 0x46b   : > { %974 = shalt.err (!%p971_p9)
}
 0x46c   : > { %766 = dma.vmem_to_hbm [thread:$0]  (%p1136_p4), %s619_s29, 128, %s621_s30, %s606_s25  }
 0x46f   : > { %v602_v33 = vpop.f32.mrf.mxu0 }
 0x470 PF: > { %s632_s22 = sand.u32 1, %s1005_s18   ;;  %p1272_p10 = scmp.ge.s32.totalorder %s1017_s21, 2 }
 0x471   : > { %s633_s9 = scalar_lea.sflag [#allocation6], %s632_s22 }
 0x472   : > { %p780_p13 = pnand %p1272_p10, %p1140_p6 }
 0x474   : > { %p781_p11 = pneg %p780_p13 }
 0x476   : > { %1000 = dma.done.wait (%p781_p11), %s633_s9, 128  }
 0x477   : > { %1002 = vsyncadd (%p781_p11), %s633_s9, 4294967168  ;;  %p19_p0 = scmp.ge.s32.totalorder %s1110_s12, 4   ;;  %s1273_s18 = smov %s1009_s19 }
 0x478   : > { %s1274_s19 = smov %s1013_s20  ;;  %s1275_s20 = smov %s1121_s15 }
 0x479   : > { %s1276_s21 = smov %s1110_s12  ;;  %21 = sbr.rel (!%p19_p0) target bundleno = 6 (0x6), region = 93 }
 0x47e   :  { %639 = vsyncpa [#allocation5], 1 }
 0x47f   :  { %641 = vsyncpa [#allocation5 + $0x1], 1 }
 0x480   :  { %642 = vsyncpa [#allocation8], 1 }
 0x481   :  { %643 = vsyncpa [#allocation6], 1 }
 0x482   :  { %645 = vsyncpa [#allocation6 + $0x1], 1 }

</bundles_post_ra>
